<compile_context>
chip_gen: v7x
topology: tpu7x:2x2x1
jax: 0.10.0
libtpu: 0.0.40
codegen_flags: <defaults>
</compile_context>

<pallas_src>
import math
from functools import partial

import jax
import jax.numpy as jnp
from jax.experimental import pallas as pl
from jax.experimental.pallas import tpu as pltpu


def _add_margin_kernel(label_ref, x_ref, w_ref, inv_x_ref, inv_w_ref, o_ref,
                       *, s, m, tile_c):
    """Produce one (N, TILE_C) output tile.

    label_ref: (N, 1) i32, x_ref: (N, D) f32, w_ref: (TILE_C, D) f32,
    inv_x_ref: (N, 1) f32 = 1/||x||, inv_w_ref: (1, TILE_C) f32 = 1/||w||.
    """
    # logits tile = X @ W_tile^T  -> (N, TILE_C)   [MXU]
    logits = jax.lax.dot_general(
        x_ref[...], w_ref[...], (((1,), (1,)), ((), ())),
        preferred_element_type=jnp.float32,
    )

    # cosine = logits / (||x_i|| * ||w_j||) as reciprocal multiplies (VPU only).
    cosine = logits * inv_x_ref[...] * inv_w_ref[...]

    # one-hot over this class tile (column iota offset by the tile origin).
    n, tc = cosine.shape
    col = jax.lax.broadcasted_iota(jnp.int32, (n, tc), 1) + pl.program_id(0) * tile_c
    is_target = col == label_ref[...]

    out = jnp.where(is_target, cosine - m, cosine) * s
    o_ref[...] = out.astype(o_ref.dtype)


def add_margin_product(x, label, weight, *, s=30.0, m=0.4, tile_c=128):
    """AddMarginProduct forward.

    x: (N, in_features) f32, label: (N,) int, weight: (out_features, in_features) f32.
    Returns (N, out_features) f32.
    """
    n, d = x.shape
    c, d2 = weight.shape
    assert d == d2, "weight must be (out_features, in_features)"

    x = x.astype(jnp.float32)
    weight = weight.astype(jnp.float32)

    if c % tile_c != 0 or c < tile_c:
        tile_c = c  # single full-width tile fallback (block == full dim is legal)
    grid_c = c // tile_c

    # One-time norm reciprocals, hoisted out of the hot kernel.
    inv_x = 1.0 / jnp.sqrt(jnp.sum(x * x, axis=1, keepdims=True) + 1e-12)   # (N, 1)
    inv_w = (1.0 / jnp.sqrt(jnp.sum(weight * weight, axis=1) + 1e-12)
             ).reshape(1, c)                                                # (1, C)
    label_2d = label.reshape(n, 1).astype(jnp.int32)

    kernel = partial(_add_margin_kernel, s=float(s), m=float(m), tile_c=tile_c)

    # VMEM estimate: double-buffered W tile + double-buffered output tile +
    # resident X / label / norms, plus headroom.  Clamp to a safe range
    # (>= default scoped limit, <= v7x physical VMEM).
    vmem_needed = (2 * tile_c * d * 4          # W tiles (x2 buffers)
                   + 2 * n * tile_c * 4        # output tiles (x2 buffers)
                   + n * d * 4                 # resident X
                   + 2 * 2 * tile_c * 4        # inv_w tiles
                   + 2 * n * 4 * 2)            # label + inv_x
    vmem_limit = min(max(vmem_needed + (8 << 20), 32 << 20), 64 << 20)

    cost = pl.CostEstimate(
        flops=2 * n * c * d,
        transcendentals=0,
        bytes_accessed=4 * (n * d + c * d + n * c + n + c),
    )

    return pl.pallas_call(
        kernel,
        out_shape=jax.ShapeDtypeStruct((n, c), jnp.float32),
        grid_spec=pltpu.PrefetchScalarGridSpec(
            num_scalar_prefetch=0,
            grid=(grid_c,),
            in_specs=[
                pl.BlockSpec((n, 1), lambda j: (0, 0)),        # label   (resident)
                pl.BlockSpec((n, d), lambda j: (0, 0)),        # X       (resident)
                pl.BlockSpec((tile_c, d), lambda j: (j, 0)),   # W tile  (pipelined)
                pl.BlockSpec((n, 1), lambda j: (0, 0)),        # 1/||x|| (resident)
                pl.BlockSpec((1, tile_c), lambda j: (0, j)),   # 1/||w|| tile
            ],
            out_specs=pl.BlockSpec((n, tile_c), lambda j: (0, j)),
        ),
        compiler_params=pltpu.CompilerParams(
            dimension_semantics=("parallel",),   # shard class tiles across TCs (v7x)
            vmem_limit_bytes=vmem_limit,
        ),
        cost_estimate=cost,
    )(label_2d, x, weight, inv_x, inv_w)


def _reference(x, label, weight, *, s=30.0, m=0.4):
    """Plain-JAX reference of the PyTorch forward, for a sanity check."""
    logits = jnp.dot(x, weight.T, precision=jax.lax.Precision.HIGHEST)
    x_dist = jnp.sqrt(jnp.sum(x * x, axis=1, keepdims=True) + 1e-12)
    w_dist = jnp.sqrt(jnp.sum(weight * weight, axis=1) + 1e-12).reshape(1, -1)
    cosine = logits / (x_dist * w_dist)
    phi = cosine - m
    one_hot = jax.nn.one_hot(label, weight.shape[0], dtype=cosine.dtype)
    return jnp.where(one_hot == 1, phi, cosine) * s


if __name__ == "__main__":
    key = jax.random.PRNGKey(0)
    kx, kw, kl = jax.random.split(key, 3)

    # Small shapes consistent with the module: batch=8, in_features=32,
    # out_features=256 (2 class tiles of 128 to exercise the grid).
    N, D, C = 8, 32, 256
    x = jax.random.normal(kx, (N, D), dtype=jnp.float32)

    # Deterministic weight init mimicking nn.Linear default (uniform +-1/sqrt(fan_in)).
    bound = 1.0 / math.sqrt(D)
    weight = jax.random.uniform(kw, (C, D), dtype=jnp.float32,
                                minval=-bound, maxval=bound)
    label = jax.random.randint(kl, (N,), 0, C, dtype=jnp.int32)

    out = add_margin_product(x, label, weight, s=30.0, m=0.4)
    jax.block_until_ready(out)

    assert out.shape == (N, C) and out.dtype == jnp.float32
    ref = _reference(x, label, weight, s=30.0, m=0.4)
    assert jnp.allclose(out, ref, rtol=3e-2, atol=3e-1), "kernel mismatch vs reference"
    print("KERNEL_OK")
</pallas_src>

<mosaic_0001>
module attributes {stable_mosaic.version = 11 : i64} {
  func.func @_add_margin_kernel(%arg0: i32, %arg1: memref<8x1xi32, #tpu.memory_space<vmem>>, %arg2: memref<8x32xf32, #tpu.memory_space<vmem>>, %arg3: memref<128x32xf32, #tpu.memory_space<vmem>>, %arg4: memref<8x1xf32, #tpu.memory_space<vmem>>, %arg5: memref<1x128xf32, #tpu.memory_space<vmem>>, %arg6: memref<8x128xf32, #tpu.memory_space<vmem>>) attributes {dimension_semantics = [#tpu.dimension_semantics<parallel>], iteration_bounds = array<i64: 2>, scalar_prefetch = 0 : i64, scratch_operands = 0 : i64, tpu.core_type = #tpu.core_type<tc>, window_params = [{pipeline_mode = #tpu.pipeline_mode<synchronous>, transform_indices = @transform_0, window_bounds = array<i64: 8, 1>}, {pipeline_mode = #tpu.pipeline_mode<synchronous>, transform_indices = @transform_1, window_bounds = array<i64: 8, 32>}, {transform_indices = @transform_2, window_bounds = array<i64: 128, 32>}, {pipeline_mode = #tpu.pipeline_mode<synchronous>, transform_indices = @transform_3, window_bounds = array<i64: 8, 1>}, {transform_indices = @transform_4, window_bounds = array<i64: 1, 128>}, {transform_indices = @transform_5, window_bounds = array<i64: 8, 128>}]} {
    %c0 = arith.constant 0 : index
    %c0_0 = arith.constant 0 : index
    %0 = vector.load %arg2[%c0, %c0_0] : memref<8x32xf32, #tpu.memory_space<vmem>>, vector<8x32xf32>
    %c0_1 = arith.constant 0 : index
    %c0_2 = arith.constant 0 : index
    %1 = vector.load %arg3[%c0_1, %c0_2] : memref<128x32xf32, #tpu.memory_space<vmem>>, vector<128x32xf32>
    %cst = arith.constant dense<0.000000e+00> : vector<8x128xf32>
    %2 = tpu.matmul %0, %1, %cst {dimension_numbers = #tpu.dot_dimension_numbers<[1], [1], [0], [0], [0, 0, 1, 0], [], []>} : vector<8x32xf32>, vector<128x32xf32>, vector<8x128xf32> -> vector<8x128xf32>
    %c0_3 = arith.constant 0 : index
    %c0_4 = arith.constant 0 : index
    %3 = vector.load %arg4[%c0_3, %c0_4] : memref<8x1xf32, #tpu.memory_space<vmem>>, vector<8x1xf32>
    %4 = vector.broadcast %3 : vector<8x1xf32> to vector<8x128xf32>
    %5 = arith.mulf %2, %4 : vector<8x128xf32>
    %c0_5 = arith.constant 0 : index
    %c0_6 = arith.constant 0 : index
    %6 = vector.load %arg5[%c0_5, %c0_6] : memref<1x128xf32, #tpu.memory_space<vmem>>, vector<1x128xf32>
    %7 = vector.broadcast %6 : vector<1x128xf32> to vector<8x128xf32>
    %8 = arith.mulf %5, %7 : vector<8x128xf32>
    %9 = tpu.iota {dimensions = array<i32: 1>} : vector<8x128xi32>
    %c128_i32 = arith.constant 128 : i32
    %10 = arith.muli %arg0, %c128_i32 : i32
    %11 = vector.broadcast %10 : i32 to vector<8x128xi32>
    %12 = arith.addi %9, %11 : vector<8x128xi32>
    %c0_7 = arith.constant 0 : index
    %c0_8 = arith.constant 0 : index
    %13 = vector.load %arg1[%c0_7, %c0_8] : memref<8x1xi32, #tpu.memory_space<vmem>>, vector<8x1xi32>
    %14 = vector.broadcast %13 : vector<8x1xi32> to vector<8x128xi32>
    %15 = arith.cmpi eq, %12, %14 : vector<8x128xi32>
    %cst_9 = arith.constant 4.000000e-01 : f32
    %16 = vector.broadcast %cst_9 : f32 to vector<8x128xf32>
    %17 = arith.subf %8, %16 : vector<8x128xf32>
    %18 = arith.select %15, %17, %8 : vector<8x128xi1>, vector<8x128xf32>
    %cst_10 = arith.constant 3.000000e+01 : f32
    %19 = vector.broadcast %cst_10 : f32 to vector<8x128xf32>
    %20 = arith.mulf %18, %19 : vector<8x128xf32>
    %c0_11 = arith.constant 0 : index
    %c0_12 = arith.constant 0 : index
    %21 = vector.load %arg6[%c0_11, %c0_12] : memref<8x128xf32, #tpu.memory_space<vmem>>, vector<8x128xf32>
    tpu.vector_store %arg6[%c0_11, %c0_12], %20 {strides = array<i32>} : memref<8x128xf32, #tpu.memory_space<vmem>>, vector<8x128xf32>,
    return
  }
  func.func @transform_0(%arg0: i32) -> (i32, i32) {
    %c0_i32 = arith.constant 0 : i32
    %c0_i32_0 = arith.constant 0 : i32
    %c0_i32_1 = arith.constant 0 : i32
    return %c0_i32, %c0_i32_0 : i32, i32
  }
  func.func @transform_1(%arg0: i32) -> (i32, i32) {
    %c0_i32 = arith.constant 0 : i32
    %c0_i32_0 = arith.constant 0 : i32
    %c0_i32_1 = arith.constant 0 : i32
    return %c0_i32, %c0_i32_0 : i32, i32
  }
  func.func @transform_2(%arg0: i32) -> (i32, i32) {
    %c0_i32 = arith.constant 0 : i32
    %c0_i32_0 = arith.constant 0 : i32
    return %arg0, %c0_i32 : i32, i32
  }
  func.func @transform_3(%arg0: i32) -> (i32, i32) {
    %c0_i32 = arith.constant 0 : i32
    %c0_i32_0 = arith.constant 0 : i32
    %c0_i32_1 = arith.constant 0 : i32
    return %c0_i32, %c0_i32_0 : i32, i32
  }
  func.func @transform_4(%arg0: i32) -> (i32, i32) {
    %c0_i32 = arith.constant 0 : i32
    %c0_i32_0 = arith.constant 0 : i32
    return %c0_i32, %arg0 : i32, i32
  }
  func.func @transform_5(%arg0: i32) -> (i32, i32) {
    %c0_i32 = arith.constant 0 : i32
    %c0_i32_0 = arith.constant 0 : i32
    return %c0_i32, %arg0 : i32, i32
  }
}

</mosaic_0001>

<bundles_post_ra>
// kernel: tpu_custom_call.1
= control target key start
LH: loop header
LB: loop body
LE: loop exit
PB: predicated region body
PF: predicated region fallthrough
CT: control target
= control target key end

     0   :  { %10 = vsyncpa [#allocation3], 0  ;;  %s901_s0 = inlined_call_operand.vmem [shape: s32[8,1], index: 0, kind: input, shape index: {}]   ;;  %s902_s1 = inlined_call_operand.vmem [shape: f32[8,32], index: 1, kind: input, shape index: {}]   ;;  %s903_s2 = inlined_call_operand.vmem [shape: f32[256,32], index: 2, kind: input, shape index: {}]   ;;  %s904_s3 = inlined_call_operand.vmem [shape: f32[8,1], index: 3, kind: input, shape index: {}]   ;;  %s905_s4 = inlined_call_operand.vmem [shape: f32[1,256], index: 4, kind: input, shape index: {}]   ;;  %s906_s5 = inlined_call_operand.hbm [shape: f32[8,256], index: 5, kind: output, shape index: {}]  }
   0x1   :  { %12 = vsyncpa [#allocation3 + $0x1], 0  ;;  %s747_s18 = smov 0   ;;  %s749_s19 = smov 0  }
   0x2   :  { %s751_s20 = smov 0   ;;  %s753_s21 = smov 0  }
   0x3 LB: > { %s768_s22 = sadd.s32 4294967295, %s710_s21   ;;  %s489_s23 = sadd.s32 4294967294, %s710_s21   ;;  %s710_s21 = sphi %s753_s21, %s914_s21   ;;  %s706_s20 = sphi %s751_s20, %s913_s20   ;;  %s702_s19 = sphi %s749_s19, %s912_s19   ;;  %s698_s18 = sphi %s747_s18, %s911_s18  }
   0x4   : > { %s772_s24 = sadd.s32 1, %s710_s21   ;;  %s140_s25 = sadd.s32 1, %s706_s20 }
   0x5   : > { %s137_s26 = ssub.s32 %s710_s21, %s772_s24  ;;  %p150_p0 = scmp.ne.s32.totalorder %s706_s20, %s702_s19 }
   0x6   : > { %p138_p1 = scmp.eq.s32.totalorder %s137_s26, 0  ;;  %p151_p2 = scmp.eq.s32.totalorder %s768_s22, 1 }
   0x7   : > { %p156_p3 = scmp.ne.s32.totalorder %s702_s19, %s698_s18  ;;  %p157_p4 = scmp.eq.s32.totalorder %s489_s23, 1 }
   0x8   : > { %s783_s27 = scalar_select %p138_p1, %s706_s20, %s140_s25  }
   0x9   : > { %p785_p5 = por %p151_p2, %p150_p0  ;;  %p789_p6 = por %p157_p4, %p156_p3 }
   0xa   : > { %p492_p7 = scmp.ge.s32.totalorder %s710_s21, 1  ;;  %p199_p8 = scmp.lt.s32.totalorder %s710_s21, 3 }
   0xc   : > { %p200_p9 = pnand %p492_p7, %p199_p8 }
   0xd   : > { %s494_s30 = sshll.u32 (!%p200_p9), %s768_s22, 4  ;;  %v712_v0 = vmov (!%p200_p9), 0.0|0.0   ;;  %vm713_vm0 = vmmov (!%p200_p9), 0   ;;  %v714_v1 = vmov (!%p200_p9), 0.0   ;;  %v378_v2 = vld [vmem:[%s904_s3] sm:$0xff] (!%p200_p9)  ;;  %v715_v3 = vmov (!%p200_p9), 0  }
   0xe   : > { %203 = sbr.rel (%p200_p9) target bundleno = 325 (0x145), region = 40  ;;  %572 = vmatprep.subr.bf16.mxu0 (!%p200_p9), %v712_v0  ;;  %p231_p10 = scmp.lt.s32.totalorder (!%p200_p9), %s494_s30, 31  ;;  %569 = vmatprep.mubr.msk.f32.mxu0 (!%p200_p9), %vm713_vm0, %v714_v1  ;;  %vm256_vm1 = vcmask (!%p200_p9), 261120   ;;  %v398_v4 = vld [vmem:[%s901_s0] sm:$0xff] (!%p200_p9)  ;;  %v393_v31 = vlaneseq (!%p200_p9) }
   0xf   : > { %647 = vset.pattern.permute.xlu0 (!%p200_p9), %v715_v3  ;;  %vm811_vm2 = vmpackc.low (!%p200_p9), %vm256_vm1, %vm256_vm1  ;;  %v239_v30 = vld [vmem:[%s902_s1] sm:$0xff] (!%p200_p9)  ;;  %p236_p11 = scmp.lt.s32.totalorder (!%p200_p9), %s768_s22, 1  ;;  %s514_s17 = sshll.u32 (!%p200_p9), %s768_s22, 7 }
  0x10   : > { %381 = vperm.xlu0 (!%p200_p9), %647, %v378_v2   ;;  %s227_s23 = sand.u32 (!%p200_p9), 1, %s702_s19   ;;  %v394_v33 = vand.u32 (!%p200_p9), 127, %v393_v31  ;;  %v396_v34 = vstv (!%p200_p9), %s514_s17 }
  0x11   : > { %s493_s6 = sshll.u32 (!%p200_p9), %s227_s23, 3  ;;  %s408_s11 = scalar_lea.sflag (!%p200_p9), [#allocation3], %s227_s23 }
  0x12   : > { %v397_v39 = vadd.s32 (!%p200_p9), %v396_v34, %v394_v33  ;;  %s229_s7 = scalar_lea.vmem (!%p200_p9), [#allocation2], %s493_s6 }
  0x14   : > { %400 = vperm.xlu0 (!%p200_p9), %647, %v398_v4  }
  0x15   : > { %s916_s30 = smov (!%p231_p10, %s494_s30), 31 }
  0x16   : > { %s495_s10 = sshll.u32 %s916_s30, 3 }
  0x17   : > { %s805_s13 = scalar_lea.vmem %s903_s2, %s495_s10  ;;  %s859_s10 = scalar_lea.hbm %s906_s5, %s514_s17 }
  0x18   : > { %v240_v5 = vld [vmem:[%s805_s13] sm:$0xff]  ;;  %v241_v6 = vld [vmem:[%s805_s13 + $0x8] sm:$0xff]  ;;  %v242_v9 = vld [vmem:[%s805_s13 + $0x10] sm:$0xff]  ;;  %s237_s16 = scalar_select %p236_p11, %s768_s22, 1 }
  0x19   : > { %v573_v8 = vpack.c.bf16 %v241_v6, %v240_v5  ;;  %v243_v10 = vld [vmem:[%s805_s13 + $0x18] sm:$0xff]  ;;  %v244_v12 = vld [vmem:[%s805_s13 + $0x20] sm:$0xff]  ;;  %v245_v13 = vld [vmem:[%s805_s13 + $0x28] sm:$0xff]  ;;  %s421_s22 = sshll.u32 %s229_s7, 4  ;;  %s861_s22 = int_to_ptr.vmem [resolvable:$true] %s421_s22 }
  0x1a   : > { %v577_v11 = vpack.c.bf16 %v243_v10, %v242_v9  ;;  %v581_v14 = vpack.c.bf16 %v245_v13, %v244_v12  ;;  %v246_v15 = vld [vmem:[%s805_s13 + $0x30] sm:$0xff]  ;;  %v247_v16 = vld [vmem:[%s805_s13 + $0x38] sm:$0xff]  ;;  %v248_v18 = vld [vmem:[%s805_s13 + $0x40] sm:$0xff]  ;;  %s238_s30 = scalar_lea.vmem %s905_s4, %s237_s16  ;;  %s648_s12 = scalar_lea.vmem %s861_s22, 128 }
  0x1b   : > { %575 = vmatpush3.bf16.xpose.msk.msra.mxu0 %vm811_vm2, %v573_v8  ;;  %v585_v17 = vpack.c.bf16 %v247_v16, %v246_v15  ;;  %v249_v19 = vld [vmem:[%s805_s13 + $0x48] sm:$0xff]  ;;  %v250_v21 = vld [vmem:[%s805_s13 + $0x50] sm:$0xff]  ;;  %v251_v22 = vld [vmem:[%s805_s13 + $0x58] sm:$0xff]  ;;  %p649_p12 = scmp.ne.s32.totalorder %s861_s22, %s648_s12 }
  0x1c   : > { %576 = vmatprep.subr.bf16.mxu0 %v712_v0  ;;  %v589_v20 = vpack.c.bf16 %v249_v19, %v248_v18  ;;  %v593_v23 = vpack.c.bf16 %v251_v22, %v250_v21  ;;  %v252_v24 = vld [vmem:[%s805_s13 + $0x60] sm:$0xff]  ;;  %v253_v25 = vld [vmem:[%s805_s13 + $0x68] sm:$0xff]  ;;  %v254_v27 = vld [vmem:[%s805_s13 + $0x70] sm:$0xff] }
  0x1d   : > { %v597_v26 = vpack.c.bf16 %v253_v25, %v252_v24  ;;  %v255_v28 = vld [vmem:[%s805_s13 + $0x78] sm:$0xff]  ;;  %v513_v36 = vld [vmem:[%s238_s30] ss:$0 sm:$0xff]  ;;  %p650_p13 = pnand %p649_p12, %p785_p5  ;;  %s716_s13 = smov [#allocation2]  }
  0x1e   : > { %v601_v29 = vpack.c.bf16 %v255_v28, %v254_v27  ;;  %s652_s14 = sshll.u32 %s716_s13, 4  ;;  %s653_s14 = int_to_ptr.vmem [resolvable:$false] %s652_s14 }
  0x1f   : > { %p651_p0 = pneg %p650_p13  ;;  %s654_s15 = scalar_lea.vmem %s653_s14, 256 }
  0x20   : > { %p655_p1 = scmp.lt.s32.totalorder %s861_s22, %s653_s14  ;;  %p656_p2 = scmp.lt.s32.totalorder %s654_s15, %s648_s12 }
  0x22   : > { %p657_p3 = por %p656_p2, %p655_p1 }
  0x23   : > { %579 = vmatpush3.bf16.xpose.msk.msra.mxu0 %vm811_vm2, %v577_v11 }
  0x24   : > { %580 = vmatprep.subr.bf16.mxu0 %v712_v0  ;;  %p658_p4 = pnand %p657_p3, %p651_p0 }
  0x2b   : > { %583 = vmatpush3.bf16.xpose.msk.msra.mxu0 %vm811_vm2, %v581_v14 }
  0x2c   : > { %584 = vmatprep.subr.bf16.mxu0 %v712_v0 }
  0x33   : > { %587 = vmatpush3.bf16.xpose.msk.msra.mxu0 %vm811_vm2, %v585_v17 }
  0x34   : > { %588 = vmatprep.subr.bf16.mxu0 %v712_v0 }
  0x3b   : > { %591 = vmatpush3.bf16.xpose.msk.msra.mxu0 %vm811_vm2, %v589_v20 }
  0x3c   : > { %592 = vmatprep.subr.bf16.mxu0 %v712_v0 }
  0x43   : > { %595 = vmatpush3.bf16.xpose.msk.msra.mxu0 %vm811_vm2, %v593_v23 }
  0x44   : > { %596 = vmatprep.subr.bf16.mxu0 %v712_v0 }
  0x4b   : > { %599 = vmatpush3.bf16.xpose.msk.msra.mxu0 %vm811_vm2, %v597_v26 }
  0x4c   : > { %600 = vmatprep.subr.bf16.mxu0 %v712_v0 }
  0x53   : > { %603 = vmatpush3.bf16.xpose.msk.msra.mxu0 %vm811_vm2, %v601_v29 }
  0x5a   : > { %570 = vmatmul.mubr.msk.f32.vlgmr.msra.gmra.mrb[0].mxu0 %vm256_vm1, %v239_v30 }
  0x8f   : > { %v382_v32 = vpop.permute.xlu0 %381 }
  0x93   : > { %v401_v40 = vpop.permute.xlu0 %400 }
  0x94   : > { %vm402_vm3 = vcmp.eq.s32.totalorder %v397_v39, %v401_v40 }
 0x12d   : > { %v374_v35 = vpop.f32.mrb[0].mxu0 }
 0x12e   : > { %v384_v37 = vmul.f32 %v382_v32, %v374_v35  ;;  %v571_v38 = vpop.f32.mrb[1].mxu0 }
 0x130   : > { %v392_v41 = vmul.f32 %v513_v36, %v384_v37 }
 0x132   : > { %v515_v42 = vadd.f32 -0.4, %v392_v41 }
 0x134   : > { %v404_v43 = vsel %vm402_vm3, %v515_v42, %v392_v41 }
 0x135   : > { %v405_v44 = vmul.f32 30.0, %v404_v43 }
 0x137   : > { %406 = vst [vmem:[%s229_s7] sm:$0xff] %v405_v44 }
 0x138   : > { %661 = shalt.err (!%p658_p4)
}
 0x139   : > { %s662_s16 = scalar_lea.hbm %s859_s10, 128  ;;  %s666_s25 = scalar_lea.hbm %s906_s5, 256 }
 0x13a   : > { %p663_p7 = scmp.ne.s32.totalorder %s859_s10, %s662_s16  ;;  %p667_p10 = scmp.lt.u32.totalorder %s859_s10, %s906_s5 }
 0x13b   : > { %p668_p11 = scmp.lt.u32.totalorder %s666_s25, %s662_s16  ;;  %p670_p13 = scmp.lt.u32.totalorder %s662_s16, %s859_s10 }
 0x13c   : > { %p664_p8 = pnand %p663_p7, %p785_p5 }
 0x13d   : > { %p669_p12 = por %p668_p11, %p667_p10 }
 0x13e   : > { %p665_p9 = pneg %p664_p8 }
 0x13f   : > { %p671_p0 = por %p670_p13, %p669_p12 }
 0x141   : > { %p672_p1 = pnand %p671_p0, %p665_p9 }
 0x143   : > { %675 = shalt.err (!%p672_p1)
}
 0x144   : > { %604 = dma.vmem_to_hbm [thread:$0]  (%p785_p5), %s861_s22, 128, %s859_s10, %s408_s11  }
 0x145 PF: > { %p610_p2 = scmp.ge.s32.totalorder %s710_s21, 2  ;;  %s433_s6 = sand.u32 1, %s698_s18  }
 0x146   : > { %s434_s7 = scalar_lea.sflag [#allocation3], %s433_s6 }
 0x147   : > { %p607_p3 = pnand %p610_p2, %p789_p6 }
 0x149   : > { %693 = dma.done.wait (!%p607_p3), %s434_s7, 128  }
 0x14a   : > { %695 = vsyncadd (!%p607_p3), %s434_s7, 4294967168  ;;  %p15_p4 = scmp.ge.s32.totalorder %s772_s24, 4   ;;  %s911_s18 = smov %s702_s19 }
 0x14b   : > { %s912_s19 = smov %s706_s20  ;;  %s913_s20 = smov %s783_s27 }
 0x14c   : > { %s914_s21 = smov %s772_s24  ;;  %17 = sbr.rel (!%p15_p4) target bundleno = 3 (0x3), region = 78 }
 0x153   :  { %439 = vsyncpa [#allocation3], 1 }
 0x154   :  { %441 = vsyncpa [#allocation3 + $0x1], 1 }

</bundles_post_ra>
